<compile_context>
chip_gen: v7x
topology: tpu7x:2x2x1
jax: 0.10.0
libtpu: 0.0.40
codegen_flags: <defaults>
</compile_context>

<pallas_src>
import math

import jax
import jax.numpy as jnp
from jax.experimental import pallas as pl
from jax.experimental.pallas import tpu as pltpu

_LANE_CHOICES = (4096, 2048, 1024, 512, 256, 128)
_SUBLANE = {4: 8, 2: 16, 1: 32}          # min sublane quantum per itemsize

# Abramowitz & Stegun 7.1.26 erf coefficients (|err| <= 1.5e-7), with the 0.5
# of Phi = 0.5*(1 +/- erf) pre-folded in at trace time (saves one vmul/elem).
_P = 0.3275911
_C1 = 0.5 * 0.254829592
_C2 = 0.5 * -0.284496736
_C3 = 0.5 * 1.421413741
_C4 = 0.5 * -1.453152027
_C5 = 0.5 * 1.061405429


def _normal_cdf_kernel(params_ref, x_ref, o_ref):
    mu = params_ref[0]                      # SMEM scalar
    inv = params_ref[1]                     # 1 / (sigma * sqrt(2)), SMEM scalar
    z = (x_ref[...].astype(jnp.float32) - mu) * inv
    a = jnp.abs(z)
    # Exact f32 divide (accuracy-critical; approx rcp + 1 Newton was too coarse).
    t = 1.0 / (1.0 + _P * a)
    half_poly = t * (_C1 + t * (_C2 + t * (_C3 + t * (_C4 + t * _C5))))
    tail = half_poly * jnp.exp(-(a * a))    # = 0.5 * (1 - erf(|z|)), exp on EUP
    phi = jnp.where(z < 0.0, tail, 1.0 - tail)
    o_ref[...] = phi.astype(o_ref.dtype)


def _target_tile_bytes():
    """~4 MiB blocks on v6e/v7x (32 MiB scoped VMEM default), ~2 MiB elsewhere."""
    try:
        kind = jax.devices()[0].device_kind.lower()
    except Exception:
        return 2 * 1024 * 1024
    if "v6" in kind or "v7" in kind:
        return 4 * 1024 * 1024
    return 2 * 1024 * 1024


def _pick_lane(total):
    """Widest lane width that divides total exactly (no-pad fast path)."""
    for w in _LANE_CHOICES:
        if total % w == 0:
            return w
    return None


def _pick_row_tile(rows, lane, itemsize):
    """Row tile: biggest block under the VMEM target, but >= 2 grid steps for
    mid-size arrays so both v7x TensorCores get work and DMA overlaps compute."""
    sub = _SUBLANE.get(itemsize, 8)
    max_rows = max(sub, (_target_tile_bytes() // (lane * itemsize)) // sub * sub)
    if rows > max_rows:
        return max_rows
    if rows >= 2 * sub and rows * lane * itemsize > 256 * 1024:
        return pl.cdiv(pl.cdiv(rows, 2), sub) * sub       # >= 2 grid steps
    return rows


def _run_slab(slab, params, rows, lane, row_tile, out_dtype):
    itemsize = jnp.dtype(out_dtype).itemsize
    cost = pl.CostEstimate(
        flops=24 * rows * lane,
        transcendentals=rows * lane,
        bytes_accessed=2 * rows * lane * itemsize,
    )
    return pl.pallas_call(
        _normal_cdf_kernel,
        out_shape=jax.ShapeDtypeStruct((rows, lane), out_dtype),
        grid=(pl.cdiv(rows, row_tile),),
        in_specs=[
            pl.BlockSpec(memory_space=pltpu.MemorySpace.SMEM),   # (mu, inv) scalars
            pl.BlockSpec((row_tile, lane), lambda i: (i, 0)),
        ],
        out_specs=pl.BlockSpec((row_tile, lane), lambda i: (i, 0)),
        compiler_params=pltpu.CompilerParams(
            dimension_semantics=("parallel",)),
        cost_estimate=cost,
    )(params, slab)


def normal_cdf(x, mu=0.0, sigma=1.0):
    """Pallas TPU implementation of torch.distributions.Normal(mu, sigma).cdf(x)."""
    orig_shape = x.shape
    orig_dtype = x.dtype
    total = x.size
    if total == 0:
        return x
    itemsize = jnp.dtype(orig_dtype).itemsize

    inv = 1.0 / (float(sigma) * math.sqrt(2.0))
    params = jnp.array([float(mu), inv], dtype=jnp.float32)

    lane = _pick_lane(total)
    if lane is not None:
        # Fast path: zero-copy reshape to a lane-dense 2-D slab.
        rows = total // lane
        row_tile = _pick_row_tile(rows, lane, itemsize)
        out = _run_slab(x.reshape(rows, lane), params, rows, lane, row_tile, orig_dtype)
        return out.reshape(orig_shape)

    # Ragged element count.
    flat = x.reshape(-1)
    lane = next((w for w in _LANE_CHOICES if total >= w), None)
    if lane is None:
        # Fewer than 128 elements: one tiny full-array block.
        out = _run_slab(flat.reshape(1, total), params, 1, total, 1, orig_dtype)
        return out.reshape(orig_shape)

    # Kernel on the largest lane-aligned prefix; finish the (< lane)-element
    # remainder in plain XLA (avoids the old pad + post-slice full HBM passes).
    n_main = (total // lane) * lane
    rows = n_main // lane
    row_tile = _pick_row_tile(rows, lane, itemsize)
    main_out = _run_slab(flat[:n_main].reshape(rows, lane), params,
                         rows, lane, row_tile, orig_dtype)
    rem = flat[n_main:]
    z_rem = (rem.astype(jnp.float32) - params[0]) * params[1]
    rem_out = (0.5 * (1.0 + jax.lax.erf(z_rem))).astype(orig_dtype)
    return jnp.concatenate([main_out.reshape(-1), rem_out]).reshape(orig_shape)


class MyNormalPallas:
    """Mirror of the PyTorch `my_normal` module (forward = Normal(mu, sigma).cdf(x))."""

    def __init__(self, mu, sigma):
        self.mu = float(mu)
        self.sigma = float(sigma)

    def __call__(self, x):
        return normal_cdf(x, self.mu, self.sigma)


if __name__ == "__main__":
    key = jax.random.PRNGKey(0)
    mu, sigma = 0.5, 1.5
    model = MyNormalPallas(mu, sigma)

    # Small NCHW input consistent with the module's generic tensor forward.
    x = jax.random.normal(key, (2, 4, 16, 16), dtype=jnp.float32) * 2.0
    out = jax.block_until_ready(model(x))
    assert out.shape == x.shape and out.dtype == x.dtype
    assert bool(jnp.all(out >= 0.0)) and bool(jnp.all(out <= 1.0))
    ref = jax.scipy.stats.norm.cdf(x, loc=mu, scale=sigma)
    assert float(jnp.max(jnp.abs(out - ref))) < 1e-5

    # Larger input exercising the multi-step tiled path (>= 2 grid steps).
    x2 = jax.random.normal(jax.random.PRNGKey(1), (8, 8, 128, 128), dtype=jnp.float32) * 3.0
    out2 = jax.block_until_ready(normal_cdf(x2, mu, sigma))
    ref2 = jax.scipy.stats.norm.cdf(x2, loc=mu, scale=sigma)
    assert float(jnp.max(jnp.abs(out2 - ref2))) < 1e-5

    # Ragged element count exercising the prefix + XLA-remainder path.
    x3 = jax.random.normal(jax.random.PRNGKey(2), (2, 3, 7, 5), dtype=jnp.float32)
    out3 = jax.block_until_ready(normal_cdf(x3, mu, sigma))
    ref3 = jax.scipy.stats.norm.cdf(x3, loc=mu, scale=sigma)
    assert float(jnp.max(jnp.abs(out3 - ref3))) < 1e-5

    print("KERNEL_OK")
</pallas_src>

<mosaic_0001>
module attributes {stable_mosaic.version = 11 : i64} {
  func.func @_normal_cdf_kernel(%arg0: i32, %arg1: memref<2xf32, #tpu.memory_space<smem>>, %arg2: memref<1x2048xf32, #tpu.memory_space<vmem>>, %arg3: memref<1x2048xf32, #tpu.memory_space<vmem>>) attributes {dimension_semantics = [#tpu.dimension_semantics<parallel>], iteration_bounds = array<i64: 1>, scalar_prefetch = 0 : i64, scratch_operands = 0 : i64, tpu.core_type = #tpu.core_type<tc>, window_params = [{transform_indices = @transform_0, window_bounds = array<i64: 2>}, {transform_indices = @transform_1, window_bounds = array<i64: 1, 2048>}, {transform_indices = @transform_2, window_bounds = array<i64: 1, 2048>}]} {
    %c0 = arith.constant 0 : index
    %0 = memref.load %arg1[%c0] : memref<2xf32, #tpu.memory_space<smem>>
    %c1 = arith.constant 1 : index
    %1 = memref.load %arg1[%c1] : memref<2xf32, #tpu.memory_space<smem>>
    %c0_0 = arith.constant 0 : index
    %c0_1 = arith.constant 0 : index
    %2 = vector.load %arg2[%c0_0, %c0_1] : memref<1x2048xf32, #tpu.memory_space<vmem>>, vector<1x2048xf32>
    %3 = vector.broadcast %0 : f32 to vector<1x2048xf32>
    %4 = arith.subf %2, %3 : vector<1x2048xf32>
    %5 = vector.broadcast %1 : f32 to vector<1x2048xf32>
    %6 = arith.mulf %4, %5 : vector<1x2048xf32>
    %7 = math.absf %6 : vector<1x2048xf32>
    %cst = arith.constant 0.327591091 : f32
    %8 = vector.broadcast %cst : f32 to vector<1x2048xf32>
    %9 = arith.mulf %8, %7 : vector<1x2048xf32>
    %cst_2 = arith.constant 1.000000e+00 : f32
    %10 = vector.broadcast %cst_2 : f32 to vector<1x2048xf32>
    %11 = arith.addf %10, %9 : vector<1x2048xf32>
    %cst_3 = arith.constant 1.000000e+00 : f32
    %12 = vector.broadcast %cst_3 : f32 to vector<1x2048xf32>
    %13 = arith.divf %12, %11 : vector<1x2048xf32>
    %cst_4 = arith.constant 0.53070271 : f32
    %14 = vector.broadcast %cst_4 : f32 to vector<1x2048xf32>
    %15 = arith.mulf %13, %14 : vector<1x2048xf32>
    %cst_5 = arith.constant -0.72657603 : f32
    %16 = vector.broadcast %cst_5 : f32 to vector<1x2048xf32>
    %17 = arith.addf %16, %15 : vector<1x2048xf32>
    %18 = arith.mulf %13, %17 : vector<1x2048xf32>
    %cst_6 = arith.constant 0.710706889 : f32
    %19 = vector.broadcast %cst_6 : f32 to vector<1x2048xf32>
    %20 = arith.addf %19, %18 : vector<1x2048xf32>
    %21 = arith.mulf %13, %20 : vector<1x2048xf32>
    %cst_7 = arith.constant -0.142248362 : f32
    %22 = vector.broadcast %cst_7 : f32 to vector<1x2048xf32>
    %23 = arith.addf %22, %21 : vector<1x2048xf32>
    %24 = arith.mulf %13, %23 : vector<1x2048xf32>
    %cst_8 = arith.constant 0.127414793 : f32
    %25 = vector.broadcast %cst_8 : f32 to vector<1x2048xf32>
    %26 = arith.addf %25, %24 : vector<1x2048xf32>
    %27 = arith.mulf %13, %26 : vector<1x2048xf32>
    %28 = arith.mulf %7, %7 : vector<1x2048xf32>
    %cst_9 = arith.constant 0.000000e+00 : f32
    %29 = vector.broadcast %cst_9 : f32 to vector<1x2048xf32>
    %30 = arith.subf %29, %28 : vector<1x2048xf32>
    %31 = math.exp %30 : vector<1x2048xf32>
    %32 = arith.mulf %27, %31 : vector<1x2048xf32>
    %cst_10 = arith.constant 0.000000e+00 : f32
    %33 = vector.broadcast %cst_10 : f32 to vector<1x2048xf32>
    %34 = arith.cmpf olt, %6, %33 : vector<1x2048xf32>
    %cst_11 = arith.constant 1.000000e+00 : f32
    %35 = vector.broadcast %cst_11 : f32 to vector<1x2048xf32>
    %36 = arith.subf %35, %32 : vector<1x2048xf32>
    %37 = arith.select %34, %32, %36 : vector<1x2048xi1>, vector<1x2048xf32>
    %c0_12 = arith.constant 0 : index
    %c0_13 = arith.constant 0 : index
    %38 = vector.load %arg3[%c0_12, %c0_13] : memref<1x2048xf32, #tpu.memory_space<vmem>>, vector<1x2048xf32>
    tpu.vector_store %arg3[%c0_12, %c0_13], %37 {strides = array<i32>} : memref<1x2048xf32, #tpu.memory_space<vmem>>, vector<1x2048xf32>,
    return
  }
  func.func @transform_0(%arg0: i32) -> i32 {
    %c0_i32 = arith.constant 0 : i32
    %c0_i32_0 = arith.constant 0 : i32
    return %c0_i32 : i32
  }
  func.func @transform_1(%arg0: i32) -> (i32, i32) {
    %c0_i32 = arith.constant 0 : i32
    %c0_i32_0 = arith.constant 0 : i32
    return %arg0, %c0_i32 : i32, i32
  }
  func.func @transform_2(%arg0: i32) -> (i32, i32) {
    %c0_i32 = arith.constant 0 : i32
    %c0_i32_0 = arith.constant 0 : i32
    return %arg0, %c0_i32 : i32, i32
  }
}

</mosaic_0001>

<bundles_post_ra>
// kernel: tpu_custom_call.1
= control target key start
LH: loop header
LB: loop body
LE: loop exit
PB: predicated region body
PF: predicated region fallthrough
CT: control target
= control target key end

     0   :  { %7 = vsyncpa [#allocation5], 0  ;;  %s233_s0 = inlined_call_operand.hbm [shape: f32[2], index: 0, kind: input, shape index: {}]   ;;  %s234_s1 = inlined_call_operand.hbm [shape: f32[1,2048], index: 1, kind: input, shape index: {}]   ;;  %s235_s2 = inlined_call_operand.hbm [shape: f32[1,2048], index: 2, kind: output, shape index: {}]  }
   0x1   :  { %8 = vsyncpa [#allocation3], 0 }
   0x2   :  { %9 = vsyncpa [#allocation4], 0  ;;  %s119_s11 = scalar_lea.hbm %s233_s0, 16 }
   0x3   :  { %p120_p0 = scmp.ne.s32.totalorder %s233_s0, %s119_s11  ;;  %p123_p1 = scmp.lt.u32.totalorder %s119_s11, %s233_s0 }
   0x5   :  { %p125_p2 = pnand %p123_p1, %p120_p0 }
   0x7   :  { %128 = shalt.err (!%p125_p2)
}
   0x8   :  { %s179_s16 = smov [#allocation2]   ;;  %s180_s19 = smov [#allocation6]  }
   0x9   :  { %17 = dma.hbm_to_smem %s233_s0, 16, %s179_s16, [#allocation5]  }
   0xa   :  { %s24_s20 = sshll.u32 %s180_s19, 4  ;;  %s129_s23 = scalar_lea.hbm %s234_s1, 256  ;;  %s25_s20 = int_to_ptr.vmem [resolvable:$true] %s24_s20 }
   0xb   :  { %p130_p3 = scmp.ne.s32.totalorder %s234_s1, %s129_s23  ;;  %p133_p4 = scmp.lt.u32.totalorder %s129_s23, %s234_s1 }
   0xd   :  { %p135_p5 = pnand %p133_p4, %p130_p3 }
   0xf   :  { %138 = shalt.err (!%p135_p5)
}
  0x10   :  { %s139_s28 = scalar_lea.vmem %s25_s20, 256  ;;  %p144_p7 = scmp.lt.s32.totalorder %s25_s20, %s25_s20 }
  0x11   :  { %p140_p6 = scmp.ne.s32.totalorder %s25_s20, %s139_s28  ;;  %p145_p8 = scmp.lt.s32.totalorder %s139_s28, %s139_s28 }
  0x13   :  { %p146_p9 = por %p145_p8, %p144_p7 }
  0x15   :  { %p147_p10 = pnand %p146_p9, %p140_p6 }
  0x17   :  { %150 = shalt.err (!%p147_p10)
}
  0x18   :  { %27 = dma.hbm_to_vmem [thread:$0]  %s234_s1, 256, %s25_s20, [#allocation3]  }
  0x19   :  { %173 = dma.done.wait [#allocation5], 16  }
  0x1a   :  { %174 = vsyncadd [#allocation5], 4294967280 }
  0x1b   :  { %175 = dma.done.wait [#allocation3], 256  }
  0x1c   :  { %176 = vsyncadd [#allocation3], 4294967040 }
  0x1d   :  { %34 = sfence }
  0x1e   :  { %s35_s30 = sld [smem:[#allocation2]]  ;;  %s107_s3 = sld [smem:[#allocation2 + $0x1]]  ;;  %v37_v0 = vld [vmem:[#allocation6] sm:$0xff]  ;;  %v38_v1 = vld [vmem:[#allocation6 + $0x8] sm:$0xff] }
  0x1f   :  { %s181_s1 = smov [#allocation7]  }
  0x20   :  { %s97_s4 = sshll.u32 %s181_s1, 4  ;;  %s98_s4 = int_to_ptr.vmem [resolvable:$true] %s97_s4 }
  0x21   :  { %s151_s5 = scalar_lea.vmem %s98_s4, 256  ;;  %p156_p12 = scmp.lt.s32.totalorder %s98_s4, %s98_s4 }
  0x22   :  { %p152_p11 = scmp.ne.s32.totalorder %s98_s4, %s151_s5  ;;  %p157_p13 = scmp.lt.s32.totalorder %s151_s5, %s151_s5 }
  0x24   :  { %v39_v2 = vstv %s35_s30  ;;  %v42_v3 = vstv %s107_s3  ;;  %p158_p0 = por %p157_p13, %p156_p12 }
  0x25   :  { %v40_v4 = vsub.f32 %v37_v0, %v39_v2  ;;  %v41_v5 = vsub.f32 %v38_v1, %v39_v2 }
  0x26   :  { %p159_p1 = pnand %p158_p0, %p152_p11 }
  0x27   :  { %v43_v6 = vmul.f32 %v42_v3, %v40_v4  ;;  %v44_v7 = vmul.f32 %v42_v3, %v41_v5 }
  0x29   :  { %v45_v8 = vand.u32 2147483647, %v43_v6  ;;  %v46_v9 = vand.u32 2147483647, %v44_v7  ;;  %vm83_vm0 = vcmp.lt.f32.partialorder %v43_v6, 0.0  ;;  %vm84_vm1 = vcmp.lt.f32.partialorder %v44_v7, 0.0 }
  0x2b   :  { %v47_v10 = vmul.f32 0.3275911, %v45_v8  ;;  %v48_v11 = vmul.f32 0.3275911, %v46_v9  ;;  %v73_v14 = vmul.f32 %v45_v8, %v45_v8  ;;  %v74_v15 = vmul.f32 %v46_v9, %v46_v9 }
  0x2d   :  { %v49_v12 = vadd.f32 1.0, %v47_v10  ;;  %v50_v13 = vadd.f32 1.0, %v48_v11  ;;  %v75_v16 = vsub.f32 0.0, %v73_v14  ;;  %v76_v17 = vsub.f32 0.0, %v74_v15 }
  0x2f   :  { %111 = vrcp.f32 %v49_v12  ;;  %v77_v21 = vmul.f32 1.442695, %v75_v16  ;;  %v79_v24 = vmul.f32 1.442695, %v76_v17 }
  0x30   :  { %113 = vrcp.f32 %v50_v13 }
  0x31   :  { %115 = vpow2.f32 %v77_v21 }
  0x32   :  { %117 = vpow2.f32 %v79_v24 }
  0x39   :  { %v112_v18 = vpop.eup %111 }
  0x3a   :  { %v114_v19 = vpop.eup %113  ;;  %v55_v20 = vmul.f32 0.5307027, %v112_v18 }
  0x3b   :  { %v56_v22 = vmul.f32 0.5307027, %v114_v19  ;;  %v116_v37 = vpop.eup %115 }
  0x3c   :  { %v57_v23 = vadd.f32 -0.72657603, %v55_v20  ;;  %v118_v39 = vpop.eup %117 }
  0x3d   :  { %v58_v25 = vadd.f32 -0.72657603, %v56_v22 }
  0x3e   :  { %v59_v26 = vmul.f32 %v112_v18, %v57_v23 }
  0x3f   :  { %v60_v27 = vmul.f32 %v114_v19, %v58_v25 }
  0x40   :  { %v61_v28 = vadd.f32 0.7107069, %v59_v26 }
  0x41   :  { %v62_v29 = vadd.f32 0.7107069, %v60_v27 }
  0x42   :  { %v63_v30 = vmul.f32 %v112_v18, %v61_v28 }
  0x43   :  { %v64_v31 = vmul.f32 %v114_v19, %v62_v29 }
  0x44   :  { %v65_v32 = vadd.f32 -0.14224836, %v63_v30 }
  0x45   :  { %v66_v33 = vadd.f32 -0.14224836, %v64_v31 }
  0x46   :  { %v67_v34 = vmul.f32 %v112_v18, %v65_v32 }
  0x47   :  { %v68_v35 = vmul.f32 %v114_v19, %v66_v33 }
  0x48   :  { %v69_v36 = vadd.f32 0.1274148, %v67_v34 }
  0x49   :  { %v70_v38 = vadd.f32 0.1274148, %v68_v35 }
  0x4a   :  { %v71_v40 = vmul.f32 %v112_v18, %v69_v36 }
  0x4b   :  { %v72_v41 = vmul.f32 %v114_v19, %v70_v38 }
  0x4c   :  { %v81_v42 = vmul.f32 %v116_v37, %v71_v40 }
  0x4d   :  { %v82_v43 = vmul.f32 %v118_v39, %v72_v41 }
  0x4e   :  { %v85_v44 = vsub.f32 1.0, %v81_v42 }
  0x4f   :  { %v86_v45 = vsub.f32 1.0, %v82_v43 }
  0x50   :  { %v87_v46 = vsel %vm83_vm0, %v81_v42, %v85_v44 }
  0x51   :  { %89 = vst [vmem:[#allocation7] sm:$0xff] %v87_v46  ;;  %v88_v47 = vsel %vm84_vm1, %v82_v43, %v86_v45 }
  0x52   :  { %90 = vst [vmem:[#allocation7 + $0x8] sm:$0xff] %v88_v47 }
  0x53   :  { %162 = shalt.err (!%p159_p1)
}
  0x54   :  { %s163_s8 = scalar_lea.hbm %s235_s2, 256 }
  0x55   :  { %p164_p2 = scmp.ne.s32.totalorder %s235_s2, %s163_s8  ;;  %p167_p3 = scmp.lt.u32.totalorder %s163_s8, %s235_s2 }
  0x57   :  { %p169_p4 = pnand %p167_p3, %p164_p2 }
  0x59   :  { %172 = shalt.err (!%p169_p4)
}
  0x5a   :  { %100 = dma.vmem_to_hbm [thread:$0]  %s98_s4, 256, %s235_s2, [#allocation4]  }
  0x5b   :  { %177 = dma.done.wait [#allocation4], 256  }
  0x5c   :  { %178 = vsyncadd [#allocation4], 4294967040 }
  0x5d   :  { %104 = vsyncpa [#allocation3], 1 }
  0x5e   :  { %105 = vsyncpa [#allocation4], 1 }
  0x5f   :  { %106 = vsyncpa [#allocation5], 1 }

</bundles_post_ra>
